<compile_context>
chip_gen: v6e
topology: v6e:2x2x1
jax: 0.10.0
libtpu: 0.0.40
codegen_flags: <defaults>
</compile_context>

<pallas_src>
import jax
import jax.numpy as jnp
import numpy as np
from jax.experimental import pallas as pl
from jax.experimental.pallas import tpu as pltpu

EPS = 1e-5
_LANE = 128


def _smooth_entropy_kernel(ids_ref, w_ref, pred_ref, sum_ref, acc_ref):
    """One class-major block.

    ids_ref : (1, T) int32   sparse class id per anchor (-1 => ignored / padded)
    w_ref   : (1, T) f32     alpha[id] * keep * sum_j targets[:, j]  (0 if dropped)
    pred_ref: (C, T) native-dtype logits (class-major; anchors on the lane axis)
    sum_ref : (1, 1, 1) f32  per-core partial loss sum (resident over inner axis)
    acc_ref : (1, T) f32     VMEM vector accumulator, reduced once at the end
    """
    i = pl.program_id(1)

    @pl.when(i == 0)
    def _():
        acc_ref[...] = jnp.zeros_like(acc_ref)

    ids = ids_ref[...]                               # (1, T) int32
    keep = ids >= 0                                  # (1, T) bool
    w = w_ref[...]                                   # (1, T) f32

    # No full-tile pre-mask: every reduction below runs along the class
    # (sublane) axis, i.e. strictly within a lane, so any garbage in ragged /
    # duplicated pad columns stays in its own lane and is dropped by the final
    # per-lane select.
    x = pred_ref[...].astype(jnp.float32)            # (C, T)

    m = jnp.max(x, axis=0, keepdims=True)            # (1, T)
    e = jnp.exp(x - m)                               # (C, T)  only full-tile transcendental
    s = jnp.sum(e, axis=0, keepdims=True)            # (1, T)

    # Gather exp(x_c - m) for the target class with a compare+select+sum over
    # the class (sublane) axis -- no one-hot cast, no extra multiply, no 2nd exp.
    cls = jax.lax.broadcasted_iota(jnp.int32, x.shape, 0)            # (C, T)
    e_c = jnp.sum(jnp.where(cls == ids, e, 0.0), axis=0, keepdims=True)  # (1, T)

    # log(softmax + eps) only on the gathered class column.
    encty = jnp.log(e_c / s + EPS)                   # (1, T)

    # sum_j alpha_i * t_ij * enc_i == (alpha_i * sum_j t_ij) * enc_i == w_i * enc_i
    # Single (1, T) mask: select (not multiply) so pad-lane NaN/Inf never leaks.
    acc_ref[...] += jnp.where(keep, w * encty, 0.0)

    @pl.when(i == pl.num_programs(1) - 1)
    def _():
        sum_ref[0] = jnp.sum(acc_ref[...], keepdims=True)            # (1, 1)


def _pick_tile_n(n_rows, num_classes, itemsize, tile_n=None, min_blocks=2):
    """Pick the lane-tile (anchor axis). ~4 MiB per pred buffer (x2 for double
    buffering) amortizes the ~0.35us/grid-step overhead while keeping the full
    VMEM budget (pred x2 + (1,T) id/weight/acc rows) well under the 32 MiB
    scoped cap on every chip (incl. v7x's 64 MiB/TC VMEM)."""
    if tile_n is not None:
        tile_n = int(max(_LANE, (tile_n // _LANE) * _LANE))
    else:
        target_bytes = 4 * 1024 * 1024
        tile_n = (target_bytes // max(1, num_classes * itemsize)) // _LANE * _LANE
        tile_n = int(min(max(tile_n, _LANE), 64 * 1024))
        # Keep >= min_blocks blocks so BlockSpec double-buffering actually
        # overlaps DMA with compute (skip for tiny problems).
        if n_rows > min_blocks * _LANE and tile_n * min_blocks > n_rows:
            per_block = -(-n_rows // min_blocks)
            tile_n = max(_LANE, -(-per_block // _LANE) * _LANE)
    if n_rows <= tile_n:
        return n_rows, 1               # single full-extent block, zero padding
    return tile_n, -(-n_rows // tile_n)


def smooth_entropy(pred, targets, sparse_cls, alpha, reduction='mean',
                   tile_n=None, num_cores=1, pred_is_class_major=False):
    """Pallas SmoothEntroy forward.

    pred:    [N, C] logits (or [C, N] if pred_is_class_major=True)
    targets: [N, C], sparse_cls: [n, P] (n*P == N), alpha: [C]
    num_cores: pass 2 on v7x (2 TCs/chip) to shard the grid; keep 1 on v5e/v6e.
    pred/targets keep their native dtype (bf16/f32); all math is f32.
    """
    if pred_is_class_major:
        C, N = pred.shape
        pred_cm = pred                          # already [C, N]
    else:
        N, C = pred.shape
        # TODO(synk): have the producer emit class-major [C, N] logits so this
        # XLA relayout (an extra HBM read+write of pred) disappears.
        pred_cm = pred.T

    ids = sparse_cls.reshape(-1).astype(jnp.int32)
    assert ids.shape[0] == N
    assert targets.shape[0] == N and targets.shape[1] == C

    itemsize = jnp.dtype(pred.dtype).itemsize
    min_blocks = 2 * max(1, int(num_cores))
    tile, nb = _pick_tile_n(N, C, itemsize, tile_n, min_blocks=min_blocks)

    # Megacore split only when explicitly requested (v7x) and worth it.
    ncores = int(num_cores) if (int(num_cores) > 1 and nb >= int(num_cores)) else 1
    nbpc = (nb + ncores - 1) // ncores          # blocks per core
    nbt = ncores * nbpc * tile                  # padded anchor extent (tiny rows only)

    keep = ids >= 0
    safe_ids = jnp.where(keep, ids, 0)
    # Fold alpha-gather AND the whole targets row-sum host-side (one fused XLA
    # reduce pass; f32 accumulation even for bf16 targets). The kernel never
    # touches targets at all.
    t_sum = jnp.sum(targets, axis=1, dtype=jnp.float32)             # (N,)
    w = alpha.astype(jnp.float32)[safe_ids] * keep.astype(jnp.float32) * t_sum

    pad = nbt - N                               # pads only the small 1-D rows
    ids_p = jnp.pad(ids, (0, pad), constant_values=-1) if pad else ids
    w_p = jnp.pad(w, (0, pad)) if pad else w
    ids_row = ids_p.reshape(1, nbt)
    w_row = w_p.reshape(1, nbt)

    last_blk = nb - 1

    def big_map(p, i):
        # When nb is odd on the 2-core path the second core sees one fully
        # out-of-range block: clamp to the last real block (its lanes are
        # masked via ids == -1).
        return (0, jnp.minimum(p * nbpc + i, last_blk))

    def small_map(p, i):
        return (0, p * nbpc + i)

    partials = pl.pallas_call(
        _smooth_entropy_kernel,
        out_shape=jax.ShapeDtypeStruct((ncores, 1, 1), jnp.float32),
        grid_spec=pltpu.PrefetchScalarGridSpec(
            num_scalar_prefetch=0,
            grid=(ncores, nbpc),
            in_specs=[
                pl.BlockSpec((1, tile), small_map),   # sparse class ids
                pl.BlockSpec((1, tile), small_map),   # alpha[id]*keep*sum_j t
                pl.BlockSpec((C, tile), big_map),     # pred (class-major)
            ],
            out_specs=pl.BlockSpec((1, 1, 1), lambda p, i: (p, 0, 0)),
            scratch_shapes=[pltpu.VMEM((1, tile), jnp.float32)],
        ),
        compiler_params=pltpu.CompilerParams(
            dimension_semantics=("parallel", "arbitrary"),
            vmem_limit_bytes=32 * 1024 * 1024),
    )(ids_row, w_row, pred_cm)

    total = jnp.sum(partials)
    if reduction == 'mean':
        # Matches the reference exactly (NaN for an all-ignored batch, like the
        # PyTorch module); add jnp.maximum(num_keep, 1) if empty batches occur.
        num_keep = jnp.sum(keep.astype(jnp.int32))
        return total / (num_keep.astype(jnp.float32) * jnp.float32(C))
    return total


def _reference(pred, targets, sparse_cls, alpha, reduction='mean'):
    """Pure-JAX reference of the (intended) forward pass."""
    C = pred.shape[1]
    pred = pred.astype(jnp.float32)
    targets = targets.astype(jnp.float32)
    sm = jax.nn.softmax(pred, axis=1)
    logp = jnp.log(sm + EPS)
    ids = sparse_cls.reshape(-1)
    keep = ids >= 0
    safe_ids = jnp.where(keep, ids, 0)
    encty = jnp.take_along_axis(logp, safe_ids[:, None], axis=1)       # (N, 1)
    a = alpha.astype(jnp.float32)[safe_ids][:, None]                   # (N, 1)
    loss = a * targets * encty * keep[:, None].astype(jnp.float32)     # (N, C)
    if reduction == 'mean':
        return jnp.sum(loss) / (jnp.sum(keep).astype(jnp.float32) * C)
    return jnp.sum(loss)


if __name__ == "__main__":
    k1, k2, k3, k4, k5, k6, k7, k8, k9, k10 = jax.random.split(
        jax.random.PRNGKey(0), 10)

    # Case 1: tiny shapes from the module docstring (single full-extent block).
    C1, n1, p1 = 8, 2, 8
    N1 = n1 * p1
    pred1 = jax.random.normal(k1, (N1, C1), dtype=jnp.float32)
    tgt1 = jax.random.uniform(k2, (N1, C1), dtype=jnp.float32)
    cls1 = jax.random.randint(k3, (n1, p1), -1, C1, dtype=jnp.int32)
    alpha1 = jnp.ones((C1,), dtype=jnp.float32)   # SmoothEntroy default weights=1.0

    out1 = jax.block_until_ready(smooth_entropy(pred1, tgt1, cls1, alpha1))
    ref1 = jax.block_until_ready(_reference(pred1, tgt1, cls1, alpha1))
    np.testing.assert_allclose(np.asarray(out1), np.asarray(ref1),
                               rtol=1e-5, atol=1e-6)

    out1s = jax.block_until_ready(
        smooth_entropy(pred1, tgt1, cls1, alpha1, reduction='sum'))
    ref1s = jax.block_until_ready(
        _reference(pred1, tgt1, cls1, alpha1, reduction='sum'))
    np.testing.assert_allclose(np.asarray(out1s), np.asarray(ref1s),
                               rtol=1e-5, atol=1e-6)

    # Case 2: bf16 inputs, non-uniform alpha, multi-block ragged grid with the
    # explicit 2-core split (tile_n=128 -> 5 blocks, odd count, ragged last
    # block, odd-block clamp path).
    C2, n2, p2 = 16, 3, 200
    N2 = n2 * p2
    pred2 = jax.random.normal(k4, (N2, C2), dtype=jnp.float32).astype(jnp.bfloat16)
    tgt2 = jax.random.uniform(k5, (N2, C2), dtype=jnp.float32).astype(jnp.bfloat16)
    cls2 = jax.random.randint(k6, (n2, p2), -1, C2, dtype=jnp.int32)
    alpha2 = jnp.linspace(0.5, 1.5, C2, dtype=jnp.float32)

    out2 = jax.block_until_ready(
        smooth_entropy(pred2, tgt2, cls2, alpha2, tile_n=128, num_cores=2))
    ref2 = jax.block_until_ready(_reference(pred2, tgt2, cls2, alpha2))
    np.testing.assert_allclose(np.asarray(out2), np.asarray(ref2),
                               rtol=1e-4, atol=1e-5)

    # Case 3: class-major producer path (zero host transpose), auto tiling
    # (exercises the >=2-block split: N=1000 -> tile 512, 2 blocks, ragged).
    C3, n3, p3 = 12, 4, 250
    N3 = n3 * p3
    pred3_cm = jax.random.normal(k7, (C3, N3), dtype=jnp.float32)   # [C, N]
    tgt3 = jax.random.uniform(k8, (N3, C3), dtype=jnp.float32)
    cls3 = jax.random.randint(k9, (n3, p3), -1, C3, dtype=jnp.int32)
    alpha3 = jax.random.uniform(k10, (C3,), minval=0.5, maxval=1.5,
                                dtype=jnp.float32)

    out3 = jax.block_until_ready(
        smooth_entropy(pred3_cm, tgt3, cls3, alpha3, pred_is_class_major=True))
    ref3 = jax.block_until_ready(_reference(pred3_cm.T, tgt3, cls3, alpha3))
    np.testing.assert_allclose(np.asarray(out3), np.asarray(ref3),
                               rtol=1e-4, atol=1e-5)

    print("KERNEL_OK")
</pallas_src>

<mosaic_0001>
module attributes {stable_mosaic.version = 11 : i64} {
  func.func @_smooth_entropy_kernel(%arg0: i32, %arg1: i32, %arg2: memref<1x16xi32, #tpu.memory_space<vmem>>, %arg3: memref<1x16xf32, #tpu.memory_space<vmem>>, %arg4: memref<8x16xf32, #tpu.memory_space<vmem>>, %arg5: memref<1x1x1xf32, #tpu.memory_space<vmem>>, %arg6: memref<1x16xf32, #tpu.memory_space<vmem>>) attributes {dimension_semantics = [#tpu.dimension_semantics<parallel>, #tpu.dimension_semantics<arbitrary>], iteration_bounds = array<i64: 1, 1>, scalar_prefetch = 0 : i64, scratch_operands = 1 : i64, tpu.core_type = #tpu.core_type<tc>, window_params = [{transform_indices = @transform_0, window_bounds = array<i64: 1, 16>}, {transform_indices = @transform_1, window_bounds = array<i64: 1, 16>}, {transform_indices = @transform_2, window_bounds = array<i64: 8, 16>}, {transform_indices = @transform_3, window_bounds = array<i64: 1, 1, 1>}]} {
    %c0_i32 = arith.constant 0 : i32
    %0 = arith.cmpi eq, %arg1, %c0_i32 : i32
    %1 = arith.extui %0 : i1 to i32
    %c0_i32_0 = arith.constant 0 : i32
    %2 = arith.cmpi ne, %1, %c0_i32_0 : i32
    scf.if %2 {
      %cst_18 = arith.constant 0.000000e+00 : f32
      %35 = vector.broadcast %cst_18 : f32 to vector<1x16xf32>
      %c0_19 = arith.constant 0 : index
      %c0_20 = arith.constant 0 : index
      %36 = vector.load %arg6[%c0_19, %c0_20] : memref<1x16xf32, #tpu.memory_space<vmem>>, vector<1x16xf32>
      tpu.vector_store %arg6[%c0_19, %c0_20], %35 {strides = array<i32>} : memref<1x16xf32, #tpu.memory_space<vmem>>, vector<1x16xf32>,
    } else {
    }
    %c0 = arith.constant 0 : index
    %c0_1 = arith.constant 0 : index
    %3 = vector.load %arg2[%c0, %c0_1] : memref<1x16xi32, #tpu.memory_space<vmem>>, vector<1x16xi32>
    %c0_i32_2 = arith.constant 0 : i32
    %4 = vector.broadcast %c0_i32_2 : i32 to vector<1x16xi32>
    %5 = arith.cmpi sge, %3, %4 : vector<1x16xi32>
    %c0_3 = arith.constant 0 : index
    %c0_4 = arith.constant 0 : index
    %6 = vector.load %arg3[%c0_3, %c0_4] : memref<1x16xf32, #tpu.memory_space<vmem>>, vector<1x16xf32>
    %c0_5 = arith.constant 0 : index
    %c0_6 = arith.constant 0 : index
    %7 = vector.load %arg4[%c0_5, %c0_6] : memref<8x16xf32, #tpu.memory_space<vmem>>, vector<8x16xf32>
    %cst = arith.constant dense<0xFF800000> : vector<16xf32>
    %8 = vector.multi_reduction <maximumf>, %7, %cst [0] : vector<8x16xf32> to vector<16xf32>
    %9 = vector.shape_cast %8 : vector<16xf32> to vector<1x16xf32>
    %10 = vector.broadcast %9 : vector<1x16xf32> to vector<8x16xf32>
    %11 = arith.subf %7, %10 : vector<8x16xf32>
    %12 = math.exp %11 : vector<8x16xf32>
    %cst_7 = arith.constant dense<0.000000e+00> : vector<16xf32>
    %13 = vector.multi_reduction <add>, %12, %cst_7 [0] : vector<8x16xf32> to vector<16xf32>
    %14 = vector.shape_cast %13 : vector<16xf32> to vector<1x16xf32>
    %15 = tpu.iota {dimensions = array<i32: 0>} : vector<8x16xi32>
    %16 = vector.broadcast %3 : vector<1x16xi32> to vector<8x16xi32>
    %17 = arith.cmpi eq, %15, %16 : vector<8x16xi32>
    %cst_8 = arith.constant 0.000000e+00 : f32
    %18 = vector.broadcast %cst_8 : f32 to vector<8x16xf32>
    %19 = arith.select %17, %12, %18 : vector<8x16xi1>, vector<8x16xf32>
    %cst_9 = arith.constant dense<0.000000e+00> : vector<16xf32>
    %20 = vector.multi_reduction <add>, %19, %cst_9 [0] : vector<8x16xf32> to vector<16xf32>
    %21 = vector.shape_cast %20 : vector<16xf32> to vector<1x16xf32>
    %22 = arith.divf %21, %14 : vector<1x16xf32>
    %cst_10 = arith.constant 9.99999974E-6 : f32
    %23 = vector.broadcast %cst_10 : f32 to vector<1x16xf32>
    %24 = arith.addf %22, %23 : vector<1x16xf32>
    %25 = math.log %24 : vector<1x16xf32>
    %c0_11 = arith.constant 0 : index
    %c0_12 = arith.constant 0 : index
    %26 = vector.load %arg6[%c0_11, %c0_12] : memref<1x16xf32, #tpu.memory_space<vmem>>, vector<1x16xf32>
    %27 = arith.mulf %6, %25 : vector<1x16xf32>
    %cst_13 = arith.constant 0.000000e+00 : f32
    %28 = vector.broadcast %cst_13 : f32 to vector<1x16xf32>
    %29 = arith.select %5, %27, %28 : vector<1x16xi1>, vector<1x16xf32>
    %30 = arith.addf %26, %29 : vector<1x16xf32>
    %c0_14 = arith.constant 0 : index
    %c0_15 = arith.constant 0 : index
    %31 = vector.load %arg6[%c0_14, %c0_15] : memref<1x16xf32, #tpu.memory_space<vmem>>, vector<1x16xf32>
    tpu.vector_store %arg6[%c0_14, %c0_15], %30 {strides = array<i32>} : memref<1x16xf32, #tpu.memory_space<vmem>>, vector<1x16xf32>,
    %c0_i32_16 = arith.constant 0 : i32
    %32 = arith.cmpi eq, %arg1, %c0_i32_16 : i32
    %33 = arith.extui %32 : i1 to i32
    %c0_i32_17 = arith.constant 0 : i32
    %34 = arith.cmpi ne, %33, %c0_i32_17 : i32
    scf.if %34 {
      %c0_18 = arith.constant 0 : index
      %c0_19 = arith.constant 0 : index
      %35 = vector.load %arg6[%c0_18, %c0_19] : memref<1x16xf32, #tpu.memory_space<vmem>>, vector<1x16xf32>
      %36 = vector.shape_cast %35 : vector<1x16xf32> to vector<1x1x16xf32>
      %cst_20 = arith.constant dense<0.000000e+00> : vector<1xf32>
      %37 = vector.multi_reduction <add>, %36, %cst_20 [1, 2] : vector<1x1x16xf32> to vector<1xf32>
      %38 = vector.shape_cast %37 : vector<1xf32> to vector<1x1x1xf32>
      %39 = vector.extract %38[0, 0, 0] : f32 from vector<1x1x1xf32>
      %40 = vector.broadcast %39 : f32 to vector<1x1xf32>
      %c0_21 = arith.constant 0 : index
      %c0_22 = arith.constant 0 : index
      %c0_23 = arith.constant 0 : index
      %41 = vector.load %arg5[%c0_21, %c0_22, %c0_23] : memref<1x1x1xf32, #tpu.memory_space<vmem>>, vector<1x1x1xf32>
      %42 = vector.shape_cast %41 : vector<1x1x1xf32> to vector<1x1xf32>
      %43 = vector.shape_cast %40 : vector<1x1xf32> to vector<1x1x1xf32>
      tpu.vector_store %arg5[%c0_21, %c0_22, %c0_23], %43 {strides = array<i32>} : memref<1x1x1xf32, #tpu.memory_space<vmem>>, vector<1x1x1xf32>,
    } else {
    }
    return
  }
  func.func @transform_0(%arg0: i32, %arg1: i32) -> (i32, i32) {
    %c1_i32 = arith.constant 1 : i32
    %0 = arith.muli %arg0, %c1_i32 : i32
    %1 = arith.addi %0, %arg1 : i32
    %c0_i32 = arith.constant 0 : i32
    %c0_i32_0 = arith.constant 0 : i32
    return %c0_i32, %1 : i32, i32
  }
  func.func @transform_1(%arg0: i32, %arg1: i32) -> (i32, i32) {
    %c1_i32 = arith.constant 1 : i32
    %0 = arith.muli %arg0, %c1_i32 : i32
    %1 = arith.addi %0, %arg1 : i32
    %c0_i32 = arith.constant 0 : i32
    %c0_i32_0 = arith.constant 0 : i32
    return %c0_i32, %1 : i32, i32
  }
  func.func @transform_2(%arg0: i32, %arg1: i32) -> (i32, i32) {
    %c1_i32 = arith.constant 1 : i32
    %0 = arith.muli %arg0, %c1_i32 : i32
    %1 = arith.addi %0, %arg1 : i32
    %c0_i32 = arith.constant 0 : i32
    %2 = arith.minsi %1, %c0_i32 : i32
    %c0_i32_0 = arith.constant 0 : i32
    %c0_i32_1 = arith.constant 0 : i32
    return %c0_i32_0, %2 : i32, i32
  }
  func.func @transform_3(%arg0: i32, %arg1: i32) -> (i32, i32, i32) {
    %c0_i32 = arith.constant 0 : i32
    %c0_i32_0 = arith.constant 0 : i32
    %c0_i32_1 = arith.constant 0 : i32
    return %arg0, %c0_i32, %c0_i32_0 : i32, i32, i32
  }
}

</mosaic_0001>

<bundles_post_ra>
// kernel: tpu_custom_call.1
= control target key start
LH: loop header
LB: loop body
LE: loop exit
PB: predicated region body
PF: predicated region fallthrough
CT: control target
= control target key end

     0   :  { %8 = vsyncpa [#allocation4], 0  ;;  %s277_s0 = inlined_call_operand.hbm [shape: s32[1,16], index: 0, kind: input, shape index: {}]   ;;  %s278_s1 = inlined_call_operand.vmem [shape: f32[1,16], index: 1, kind: input, shape index: {}]   ;;  %s279_s2 = inlined_call_operand.hbm [shape: f32[8,16], index: 2, kind: input, shape index: {}]   ;;  %s280_s3 = inlined_call_operand.hbm [shape: f32[1,1,1], index: 3, kind: output, shape index: {}]  }
   0x1   :  { %9 = vsyncpa [#allocation7], 0 }
   0x2   :  { %10 = vsyncpa [#allocation5], 0  ;;  %s235_s12 = smov [#allocation3]   ;;  %s236_s14 = smov [#allocation6]  }
   0x3   :  { %s20_s13 = sshll.u32 %s235_s12, 4  ;;  %s42_s15 = sshll.u32 %s236_s14, 4  ;;  %s21_s13 = int_to_ptr.vmem [resolvable:$true] %s20_s13  ;;  %s43_s15 = int_to_ptr.vmem [resolvable:$true] %s42_s15 }
   0x4   :  { %s177_s16 = scalar_lea.vmem %s21_s13, 16  ;;  %s181_s17 = scalar_lea.vmem %s21_s13, 32 }
   0x5   :  { %p178_p0 = scmp.ne.s32.totalorder %s21_s13, %s177_s16  ;;  %p182_p1 = scmp.lt.s32.totalorder %s21_s13, %s21_s13 }
   0x6   :  { %p183_p2 = scmp.lt.s32.totalorder %s181_s17, %s177_s16 }
   0x8   :  { %p184_p3 = por %p183_p2, %p182_p1 }
   0xa   :  { %p185_p4 = pnand %p184_p3, %p178_p0 }
   0xc   :  { %188 = shalt.err (!%p185_p4)
}
   0xd   :  { %23 = dma.hbm_to_vmem [thread:$0]  %s277_s0, 16, %s21_s13, [#allocation4]  }
   0xe   :  { %s197_s20 = scalar_lea.vmem %s43_s15, 128  ;;  %p202_p6 = scmp.lt.s32.totalorder %s43_s15, %s43_s15 }
   0xf   :  { %p198_p5 = scmp.ne.s32.totalorder %s43_s15, %s197_s20  ;;  %p203_p7 = scmp.lt.s32.totalorder %s197_s20, %s197_s20 }
  0x11   :  { %p204_p8 = por %p203_p7, %p202_p6 }
  0x13   :  { %p205_p9 = pnand %p204_p8, %p198_p5 }
  0x15   :  { %208 = shalt.err (!%p205_p9)
}
  0x16   :  { %45 = dma.hbm_to_vmem [thread:$0]  %s279_s2, 128, %s43_s15, [#allocation7]  }
  0x17   :  { %229 = dma.done.wait [#allocation4], 16  }
  0x18   :  { %230 = vsyncadd [#allocation4], 4294967280 }
  0x19   :  { %231 = dma.done.wait [#allocation7], 128  }
  0x1a   :  { %232 = vsyncadd [#allocation7], 4294967168  ;;  %vm69_vm0 = vcmask 122880   ;;  %v237_v0 = vmov 0.0   ;;  %vm75_vm1 = vcmask 130048   ;;  %v74_v1 = vld [vmem:[#allocation6] sm:$0xff]  ;;  %v93_v9 = vlaneseq }
  0x1b   :  { %70 = vst.msk [vmem:[#allocation2] sm:$0x1] %vm69_vm0, %v237_v0  ;;  %v76_v2 = vsel %vm75_vm1, %v74_v1, -inf  ;;  %v71_v14 = vld [vmem:[#allocation3] sm:$0x1]  ;;  %vm134_vm4 = vcmask 0  }
  0x1c   :  { %v77_v3 = vrot.slane %v76_v2, 4  ;;  %v94_v12 = vshrl.u32 %v93_v9, 7  ;;  %v73_v36 = vld [vmem:[%s278_s1] sm:$0x1]  ;;  %vm72_vm3 = vcmp.ge.s32.totalorder %v71_v14, 0  ;;  %s238_s1 = smov [#allocation8]  }
  0x1d   :  { %s142_s23 = sshll.u32 %s238_s1, 4  ;;  %s143_s23 = int_to_ptr.vmem [resolvable:$true] %s142_s23 }
  0x1e   :  { %v78_v4 = vmax.f32 %v76_v2, %v77_v3  ;;  %v97_v13 = vsub.s32 0, %v94_v12  ;;  %s209_s25 = scalar_lea.vmem %s143_s23, 16  ;;  %s213_s26 = scalar_lea.vmem %s143_s23, 32 }
  0x1f   :  { %p210_p10 = scmp.ne.s32.totalorder %s143_s23, %s209_s25  ;;  %p214_p11 = scmp.lt.s32.totalorder %s143_s23, %s143_s23 }
  0x20   :  { %v79_v5 = vrot.slane %v78_v4, 2  ;;  %v98_v15 = vrot.slane %v71_v14, %v97_v13  ;;  %p215_p12 = scmp.lt.s32.totalorder %s213_s26, %s209_s25 }
  0x22   :  { %v80_v6 = vmax.f32 %v78_v4, %v79_v5  ;;  %vm99_vm2 = vcmp.eq.s32.totalorder %v94_v12, %v98_v15  ;;  %v113_v38 = vld [vmem:[#allocation2] sm:$0x1]  ;;  %p216_p13 = por %p215_p12, %p214_p11 }
  0x24   :  { %v81_v7 = vrot.slane %v80_v6, 1  ;;  %p217_p0 = pnand %p216_p13, %p210_p10 }
  0x26   :  { %v82_v8 = vmax.f32 %v80_v6, %v81_v7 }
  0x28   :  { %v83_v10 = vsub.f32 %v74_v1, %v82_v8 }
  0x2a   :  { %v84_v11 = vmul.f32 1.442695, %v83_v10 }
  0x2c   :  { %163 = vpow2.f32 %v84_v11 }
  0x39   :  { %v164_v16 = vpop.eup %163 }
  0x3a   :  { %v86_v17 = vsel %vm75_vm1, %v164_v16, 0.0  ;;  %v100_v18 = vsel %vm99_vm2, %v164_v16, 0.0 }
  0x3b   :  { %v87_v19 = vrot.slane %v86_v17, 4  ;;  %v101_v20 = vsel %vm75_vm1, %v100_v18, 0.0 }
  0x3c   :  { %v102_v22 = vrot.slane %v101_v20, 4 }
  0x3d   :  { %v88_v21 = vadd.f32 %v87_v19, %v86_v17 }
  0x3e   :  { %v103_v25 = vadd.f32 %v102_v22, %v101_v20 }
  0x3f   :  { %v89_v23 = vrot.slane %v88_v21, 2 }
  0x40   :  { %v104_v28 = vrot.slane %v103_v25, 2 }
  0x41   :  { %v90_v24 = vadd.f32 %v89_v23, %v88_v21 }
  0x42   :  { %v105_v29 = vadd.f32 %v104_v28, %v103_v25 }
  0x43   :  { %v91_v26 = vrot.slane %v90_v24, 1 }
  0x44   :  { %v106_v30 = vrot.slane %v105_v29, 1 }
  0x45   :  { %v92_v27 = vadd.f32 %v91_v26, %v90_v24 }
  0x46   :  { %v107_v31 = vadd.f32 %v106_v30, %v105_v29 }
  0x47   :  { %165 = vrcp.f32 %v92_v27 }
  0x54   :  { %v166_v32 = vpop.eup %165 }
  0x55   :  { %v109_v33 = vmul.f32 %v166_v32, %v107_v31 }
  0x57   :  { %v110_v34 = vadd.f32 1e-05, %v109_v33 }
  0x59   :  { %167 = vlog2.f32 %v110_v34 }
  0x66   :  { %v168_v35 = vpop.eup %167 }
  0x67   :  { %v112_v37 = vmul.f32 0.6931472, %v168_v35 }
  0x69   :  { %v114_v39 = vmul.f32 %v112_v37, %v73_v36 }
  0x6b   :  { %v115_v40 = vsel %vm72_vm3, %v114_v39, 0.0 }
  0x6c   :  { %v116_v41 = vadd.f32 %v115_v40, %v113_v38 }
  0x6e   :  { %118 = vst.msk [vmem:[#allocation2] sm:$0x1] %vm69_vm0, %v116_v41 }
  0x75   :  { %v122_v42 = vld [vmem:[#allocation2] sm:$0x1] }
  0x76   :  { %v123_v43 = vsel %vm69_vm0, %v122_v42, 0.0 }
  0x77   :  { %124 = vadd.xlane.f32.xlu0 %v123_v43 }
 0x100   :  { %v125_v44 = vpop.xlane.xlu0 %124 }
 0x101   :  { %v126_v45 = vrot.slane %v125_v44, 4 }
 0x103   :  { %v127_v46 = vadd.f32 %v126_v45, %v125_v44 }
 0x105   :  { %v128_v47 = vrot.slane %v127_v46, 2 }
 0x107   :  { %v129_v48 = vadd.f32 %v128_v47, %v127_v46 }
 0x109   :  { %v130_v49 = vrot.slane %v129_v48, 1 }
 0x10b   :  { %v131_v50 = vadd.f32 %v130_v49, %v129_v48 }
 0x10d   :  { %157 = vpush %v131_v50 }
 0x13e   :  { %s158_s24 = spop %157 }
 0x13f   :  { %v133_v51 = vstv %s158_s24 }
 0x140   :  { %135 = vst.msk [vmem:[#allocation8] sm:$0x1] %vm134_vm4, %v133_v51 }
 0x141   :  { %220 = shalt.err (!%p217_p0)
}
 0x142   :  { %145 = dma.vmem_to_hbm [thread:$0]  %s143_s23, 16, %s280_s3, [#allocation5]  }
 0x143   :  { %233 = dma.done.wait [#allocation5], 16  }
 0x144   :  { %234 = vsyncadd [#allocation5], 4294967280 }
 0x145   :  { %149 = vsyncpa [#allocation4], 1 }
 0x146   :  { %150 = vsyncpa [#allocation7], 1 }
 0x147   :  { %151 = vsyncpa [#allocation5], 1 }

</bundles_post_ra>
